<compile_context>
chip_gen: v7x
topology: tpu7x:2x2x1
jax: 0.10.0
libtpu: 0.0.40
codegen_flags: <defaults>
</compile_context>

<pallas_src>
import math

import jax
import jax.numpy as jnp
from jax.experimental import pallas as pl
from jax.experimental.pallas import tpu as pltpu

EPS = 1e-5  # nn.LayerNorm default


def _round_up(x, m):
    return ((x + m - 1) // m) * m


def _vmem_ceiling_bytes():
    """Usable scoped-VMEM ceiling, leaving headroom for Mosaic internal scratch."""
    try:
        phys = int(pltpu.get_tpu_info().vmem_capacity_bytes)
    except Exception:
        phys = 64 << 20  # conservative default (v7x per-core VMEM)
    return max(24 << 20, min(phys - (16 << 20), 96 << 20))


def _make_kernel(d_real, d_pad, cols_inner):
    """out = LayerNorm(x) @ W' + b_eff with gamma/beta folded host-side."""
    inv_d = 1.0 / float(d_real)
    n_pad = d_pad - d_real

    def _layernorm(x_ref, out_dtype):
        x = x_ref[...].astype(jnp.float32)
        mean = jnp.sum(x, axis=-1, keepdims=True) * inv_d
        c = x - mean
        ss = jnp.sum(c * c, axis=-1, keepdims=True)
        if n_pad:
            # Padded columns of x are zero, so each contributes mean^2 to ss;
            # subtract the scalar correction instead of a per-element mask.
            ss = ss - float(n_pad) * (mean * mean)
        var = jnp.maximum(ss * inv_d, 0.0)
        xhat = c * jax.lax.rsqrt(var + EPS)
        # gamma is folded into W'; padded columns of xhat hit zero weight rows,
        # so no output masking is needed either.
        return xhat.astype(out_dtype)

    if cols_inner:
        # grid = (row tiles, col tiles); LN result cached across the col axis.
        def kernel(x_ref, w_ref, beff_ref, o_ref, y_ref):
            @pl.when(pl.program_id(1) == 0)
            def _():
                y_ref[...] = _layernorm(x_ref, y_ref.dtype)

            acc = jnp.dot(y_ref[...], w_ref[...],
                          preferred_element_type=jnp.float32)
            o_ref[...] = (acc + beff_ref[...]).astype(o_ref.dtype)
    else:
        # grid = (col tiles, row tiles); the weight slab stays resident per
        # column tile (Pallas elides the re-DMA of an unchanged block index).
        def kernel(x_ref, w_ref, beff_ref, o_ref):
            y = _layernorm(x_ref, w_ref.dtype)
            acc = jnp.dot(y, w_ref[...], preferred_element_type=jnp.float32)
            o_ref[...] = (acc + beff_ref[...]).astype(o_ref.dtype)

    return kernel


def prenorm_linear(x, gamma, beta, w, b, *, tile_rows=None, tile_cols=None,
                   matmul_dtype=None):
    """PreNorm with fn = Linear.

    x:     (..., D_in)
    gamma: (D_in,)   LayerNorm weight        beta: (D_in,)  LayerNorm bias
    w:     (D_out, D_in)  PyTorch nn.Linear layout        b: (D_out,)
    Returns LayerNorm(x) @ w.T + b with the leading shape of x preserved.
    """
    orig_shape = x.shape
    d_in = orig_shape[-1]
    d_out, d_in_w = w.shape
    assert d_in_w == d_in, (w.shape, d_in)
    rows = math.prod(orig_shape[:-1])

    if matmul_dtype is None:
        # Keep PyTorch-default numerics.  Pass matmul_dtype=jnp.bfloat16 to use
        # the native bf16 MXU path (f32 accumulation) when tolerances allow.
        matmul_dtype = x.dtype
    matmul_dtype = jnp.dtype(matmul_dtype)

    x_item = jnp.dtype(x.dtype).itemsize
    w_item = matmul_dtype.itemsize
    out_item = x_item

    # ---- Host-side folding (gamma -> W', beta/bias -> b_eff), f32 ---------
    w_mat = jnp.asarray(w, jnp.float32).T                          # (D_in, D_out)
    b_eff = jnp.asarray(beta, jnp.float32) @ w_mat + jnp.asarray(b, jnp.float32)
    w_fold = jnp.asarray(gamma, jnp.float32)[:, None] * w_mat      # fold LN gamma

    # ---- Tiling / padding geometry -----------------------------------------
    d_in_pad = _round_up(d_in, 128)
    d_out_128 = _round_up(d_out, 128)
    ceiling = _vmem_ceiling_bytes()

    # Row tile: keep (x double buffer + LN scratch) within ~35% of the budget.
    # NOTE: d_in is kept un-tiled (single K block); for extremely large d_in a
    # K-tiling grid axis with an f32 accumulator would be needed.
    per_row = d_in_pad * (2 * x_item + w_item)
    max_tr = max(8, (int(0.35 * ceiling) // per_row) // 8 * 8)
    if tile_rows is None:
        tr = min(512, max_tr, _round_up(rows, 8))
        for cand in (512, 384, 256, 192, 128):   # prefer exact divisors: no row pad
            if cand <= tr and rows % cand == 0:
                tr = cand
                break
        else:
            if rows <= tr:
                tr = _round_up(rows, 8)
        tile_rows = max(8, tr)
    else:
        tile_rows = max(8, min(_round_up(int(tile_rows), 8), _round_up(rows, 8)))
    rows_pad = _round_up(rows, tile_rows)

    # Column tile: fill remaining VMEM; bound each weight slab to <= 32 MiB.
    fixed = tile_rows * d_in_pad * (2 * x_item + w_item)
    per_col = 2 * d_in_pad * w_item + 2 * tile_rows * out_item + tile_rows * 4 + 16
    if tile_cols is None:
        budget_tc = max(128, ((max(ceiling - fixed, 0)) // per_col) // 128 * 128)
        slab_tc = max(128, ((32 << 20) // (d_in_pad * w_item)) // 128 * 128)
        tile_cols = min(d_out_128, budget_tc, slab_tc)
    else:
        tile_cols = min(_round_up(int(tile_cols), 128), d_out_128)
    d_out_pad = _round_up(d_out_128, tile_cols)

    n_row_tiles = rows_pad // tile_rows
    n_col_tiles = d_out_pad // tile_cols

    # ---- Grid order: minimize HBM traffic (same-block DMAs are elided) -----
    w_bytes = d_in_pad * d_out_pad * w_item
    x_bytes = rows_pad * d_in_pad * x_item
    traffic_cols_inner = ((w_bytes if n_col_tiles == 1 else n_row_tiles * w_bytes)
                          + x_bytes)
    traffic_rows_inner = (w_bytes
                          + (x_bytes if n_row_tiles == 1 else n_col_tiles * x_bytes))
    cols_inner = traffic_cols_inner <= traffic_rows_inner

    # ---- Pad operands only when actually needed -----------------------------
    x2 = jnp.reshape(x, (rows, d_in))
    if rows_pad != rows or d_in_pad != d_in:
        x2 = jnp.pad(x2, ((0, rows_pad - rows), (0, d_in_pad - d_in)))

    if d_in_pad != d_in or d_out_pad != d_out:
        w_fold = jnp.pad(w_fold, ((0, d_in_pad - d_in), (0, d_out_pad - d_out)))
        b_eff = jnp.pad(b_eff, (0, d_out_pad - d_out))
    w2 = w_fold.astype(matmul_dtype)
    beff2 = jnp.reshape(b_eff, (1, d_out_pad)).astype(jnp.float32)

    # ---- Specs ---------------------------------------------------------------
    x_blk = (tile_rows, d_in_pad)
    w_blk = (d_in_pad, tile_cols)
    b_blk = (1, tile_cols)
    o_blk = (tile_rows, tile_cols)

    if cols_inner:
        grid = (n_row_tiles, n_col_tiles)
        in_specs = [
            pl.BlockSpec(x_blk, lambda i, j: (i, 0)),
            pl.BlockSpec(w_blk, lambda i, j: (0, j)),
            pl.BlockSpec(b_blk, lambda i, j: (0, j)),
        ]
        out_specs = pl.BlockSpec(o_blk, lambda i, j: (i, j))
        scratch_shapes = [pltpu.VMEM((tile_rows, d_in_pad), matmul_dtype)]
        # j carries the LN scratch -> "arbitrary"; rows stay "parallel" so v7x
        # can shard row tiles across its two TensorCores.
        dims = ("parallel", "arbitrary")
    else:
        grid = (n_col_tiles, n_row_tiles)
        in_specs = [
            pl.BlockSpec(x_blk, lambda j, i: (i, 0)),
            pl.BlockSpec(w_blk, lambda j, i: (0, j)),
            pl.BlockSpec(b_blk, lambda j, i: (0, j)),
        ]
        out_specs = pl.BlockSpec(o_blk, lambda j, i: (i, j))
        scratch_shapes = []
        dims = ("parallel", "parallel")

    # ---- VMEM limit (includes f32 matmul result temp and LN scratch) -------
    est = (2 * tile_rows * d_in_pad * x_item                       # x double buffer
           + (tile_rows * d_in_pad * w_item if cols_inner else 0)  # LN scratch
           + 2 * d_in_pad * tile_cols * w_item                     # W double buffer
           + 2 * tile_rows * tile_cols * out_item                  # out double buffer
           + tile_rows * tile_cols * 4                             # f32 matmul temp
           + 2 * tile_cols * 4 + (1 << 16))                        # b_eff + slack
    vmem_limit = int(min(ceiling, max(32 << 20, est + (4 << 20))))

    kernel = _make_kernel(d_in, d_in_pad, cols_inner)

    out2 = pl.pallas_call(
        kernel,
        out_shape=jax.ShapeDtypeStruct((rows_pad, d_out_pad), x.dtype),
        grid_spec=pltpu.PrefetchScalarGridSpec(
            num_scalar_prefetch=0,
            grid=grid,
            in_specs=in_specs,
            out_specs=out_specs,
            scratch_shapes=scratch_shapes,
        ),
        compiler_params=pltpu.CompilerParams(
            dimension_semantics=dims,
            vmem_limit_bytes=vmem_limit,
        ),
    )(x2, w2, beff2)

    out = out2
    if rows_pad != rows or d_out_pad != d_out:
        out = out2[:rows, :d_out]
    return jnp.reshape(out, orig_shape[:-1] + (d_out,))


def prenorm_linear_ref(x, gamma, beta, w, b):
    """Pure-JAX reference (PyTorch semantics: Linear weight is (out, in))."""
    xf = x.astype(jnp.float32)
    mean = jnp.mean(xf, axis=-1, keepdims=True)
    var = jnp.mean((xf - mean) ** 2, axis=-1, keepdims=True)
    xhat = (xf - mean) * jax.lax.rsqrt(var + EPS)
    y = xhat * jnp.asarray(gamma, jnp.float32) + jnp.asarray(beta, jnp.float32)
    out = y @ jnp.asarray(w, jnp.float32).T + jnp.asarray(b, jnp.float32)
    return out.astype(x.dtype)


if __name__ == "__main__":
    B, S, D = 2, 8, 32

    key = jax.random.PRNGKey(0)
    kx, kw, kb, kg, kbeta = jax.random.split(key, 5)

    x = jax.random.normal(kx, (B, S, D), dtype=jnp.float32)

    # LayerNorm params: non-trivial values to exercise the gamma/beta folding.
    gamma = 1.0 + 0.1 * jax.random.normal(kg, (D,), dtype=jnp.float32)
    beta = 0.05 * jax.random.normal(kbeta, (D,), dtype=jnp.float32)

    # fn = Linear(D, D) in PyTorch layout (out_features, in_features).
    w = jax.random.normal(kw, (D, D), dtype=jnp.float32) * (1.0 / jnp.sqrt(D))
    b = jax.random.normal(kb, (D,), dtype=jnp.float32) * 0.01

    # --- f32 path: tight-precision check against the reference ---
    out = prenorm_linear(x, gamma, beta, w, b)
    out = jax.block_until_ready(out)
    ref = prenorm_linear_ref(x, gamma, beta, w, b)
    assert out.shape == (B, S, D)
    assert jnp.allclose(out, ref, atol=1e-4, rtol=1e-4)

    # --- bf16 path: matmul operands in bf16, f32 accumulation (loose check) ---
    out_bf16 = prenorm_linear(x.astype(jnp.bfloat16), gamma, beta, w, b,
                              matmul_dtype=jnp.bfloat16)
    out_bf16 = jax.block_until_ready(out_bf16)
    assert out_bf16.shape == (B, S, D)
    assert jnp.allclose(out_bf16.astype(jnp.float32), ref, atol=1e-1, rtol=1e-1)

    print("KERNEL_OK")
</pallas_src>

<mosaic_0001>
module attributes {stable_mosaic.version = 11 : i64} {
  func.func @kernel(%arg0: i32, %arg1: i32, %arg2: memref<16x128xf32, #tpu.memory_space<vmem>>, %arg3: memref<128x128xf32, #tpu.memory_space<vmem>>, %arg4: memref<1x128xf32, #tpu.memory_space<vmem>>, %arg5: memref<16x128xf32, #tpu.memory_space<vmem>>, %arg6: memref<16x128xf32, #tpu.memory_space<vmem>>) attributes {dimension_semantics = [#tpu.dimension_semantics<parallel>, #tpu.dimension_semantics<arbitrary>], iteration_bounds = array<i64: 1, 1>, scalar_prefetch = 0 : i64, scratch_operands = 1 : i64, tpu.core_type = #tpu.core_type<tc>, window_params = [{transform_indices = @transform_0, window_bounds = array<i64: 16, 128>}, {transform_indices = @transform_1, window_bounds = array<i64: 128, 128>}, {transform_indices = @transform_2, window_bounds = array<i64: 1, 128>}, {transform_indices = @transform_3, window_bounds = array<i64: 16, 128>}]} {
    %c0_i32 = arith.constant 0 : i32
    %0 = arith.cmpi eq, %arg1, %c0_i32 : i32
    %1 = arith.extui %0 : i1 to i32
    %c0_i32_0 = arith.constant 0 : i32
    %2 = arith.cmpi ne, %1, %c0_i32_0 : i32
    scf.if %2 {
      %c0_8 = arith.constant 0 : index
      %c0_9 = arith.constant 0 : index
      %10 = vector.load %arg2[%c0_8, %c0_9] : memref<16x128xf32, #tpu.memory_space<vmem>>, vector<16x128xf32>
      %cst_10 = arith.constant dense<0.000000e+00> : vector<16xf32>
      %11 = vector.multi_reduction <add>, %10, %cst_10 [1] : vector<16x128xf32> to vector<16xf32>
      %12 = vector.shape_cast %11 : vector<16xf32> to vector<16x1xf32>
      %cst_11 = arith.constant 3.125000e-02 : f32
      %13 = vector.broadcast %cst_11 : f32 to vector<16x1xf32>
      %14 = arith.mulf %12, %13 : vector<16x1xf32>
      %15 = vector.broadcast %14 : vector<16x1xf32> to vector<16x128xf32>
      %16 = arith.subf %10, %15 : vector<16x128xf32>
      %17 = arith.mulf %16, %16 : vector<16x128xf32>
      %cst_12 = arith.constant dense<0.000000e+00> : vector<16xf32>
      %18 = vector.multi_reduction <add>, %17, %cst_12 [1] : vector<16x128xf32> to vector<16xf32>
      %19 = vector.shape_cast %18 : vector<16xf32> to vector<16x1xf32>
      %20 = arith.mulf %14, %14 : vector<16x1xf32>
      %cst_13 = arith.constant 9.600000e+01 : f32
      %21 = vector.broadcast %cst_13 : f32 to vector<16x1xf32>
      %22 = arith.mulf %21, %20 : vector<16x1xf32>
      %23 = arith.subf %19, %22 : vector<16x1xf32>
      %cst_14 = arith.constant 3.125000e-02 : f32
      %24 = vector.broadcast %cst_14 : f32 to vector<16x1xf32>
      %25 = arith.mulf %23, %24 : vector<16x1xf32>
      %cst_15 = arith.constant 0.000000e+00 : f32
      %26 = vector.broadcast %cst_15 : f32 to vector<16x1xf32>
      %27 = arith.maximumf %25, %26 : vector<16x1xf32>
      %cst_16 = arith.constant 9.99999974E-6 : f32
      %28 = vector.broadcast %cst_16 : f32 to vector<16x1xf32>
      %29 = arith.addf %27, %28 : vector<16x1xf32>
      %30 = math.rsqrt %29 : vector<16x1xf32>
      %31 = vector.broadcast %30 : vector<16x1xf32> to vector<16x128xf32>
      %32 = arith.mulf %16, %31 : vector<16x128xf32>
      %c0_17 = arith.constant 0 : index
      %c0_18 = arith.constant 0 : index
      %33 = vector.load %arg6[%c0_17, %c0_18] : memref<16x128xf32, #tpu.memory_space<vmem>>, vector<16x128xf32>
      tpu.vector_store %arg6[%c0_17, %c0_18], %32 {strides = array<i32>} : memref<16x128xf32, #tpu.memory_space<vmem>>, vector<16x128xf32>,
    } else {
    }
    %c0 = arith.constant 0 : index
    %c0_1 = arith.constant 0 : index
    %3 = vector.load %arg6[%c0, %c0_1] : memref<16x128xf32, #tpu.memory_space<vmem>>, vector<16x128xf32>
    %c0_2 = arith.constant 0 : index
    %c0_3 = arith.constant 0 : index
    %4 = vector.load %arg3[%c0_2, %c0_3] : memref<128x128xf32, #tpu.memory_space<vmem>>, vector<128x128xf32>
    %cst = arith.constant dense<0.000000e+00> : vector<16x128xf32>
    %5 = tpu.matmul %3, %4, %cst {dimension_numbers = #tpu.dot_dimension_numbers<[1], [0], [0], [1], [0, 0, 1, 1], [], []>} : vector<16x128xf32>, vector<128x128xf32>, vector<16x128xf32> -> vector<16x128xf32>
    %c0_4 = arith.constant 0 : index
    %c0_5 = arith.constant 0 : index
    %6 = vector.load %arg4[%c0_4, %c0_5] : memref<1x128xf32, #tpu.memory_space<vmem>>, vector<1x128xf32>
    %7 = vector.broadcast %6 : vector<1x128xf32> to vector<16x128xf32>
    %8 = arith.addf %5, %7 : vector<16x128xf32>
    %c0_6 = arith.constant 0 : index
    %c0_7 = arith.constant 0 : index
    %9 = vector.load %arg5[%c0_6, %c0_7] : memref<16x128xf32, #tpu.memory_space<vmem>>, vector<16x128xf32>
    tpu.vector_store %arg5[%c0_6, %c0_7], %8 {strides = array<i32>} : memref<16x128xf32, #tpu.memory_space<vmem>>, vector<16x128xf32>,
    return
  }
  func.func @transform_0(%arg0: i32, %arg1: i32) -> (i32, i32) {
    %c0_i32 = arith.constant 0 : i32
    %c0_i32_0 = arith.constant 0 : i32
    return %arg0, %c0_i32 : i32, i32
  }
  func.func @transform_1(%arg0: i32, %arg1: i32) -> (i32, i32) {
    %c0_i32 = arith.constant 0 : i32
    %c0_i32_0 = arith.constant 0 : i32
    return %c0_i32, %arg1 : i32, i32
  }
  func.func @transform_2(%arg0: i32, %arg1: i32) -> (i32, i32) {
    %c0_i32 = arith.constant 0 : i32
    %c0_i32_0 = arith.constant 0 : i32
    return %c0_i32, %arg1 : i32, i32
  }
  func.func @transform_3(%arg0: i32, %arg1: i32) -> (i32, i32) {
    %c0_i32 = arith.constant 0 : i32
    return %arg0, %arg1 : i32, i32
  }
}

</mosaic_0001>

<bundles_post_ra>
// kernel: tpu_custom_call.1
= control target key start
LH: loop header
LB: loop body
LE: loop exit
PB: predicated region body
PF: predicated region fallthrough
CT: control target
= control target key end

     0   :  { %8 = vsyncpa [#allocation4], 0  ;;  %s441_s0 = inlined_call_operand.hbm [shape: f32[16,128], index: 0, kind: input, shape index: {}]   ;;  %s442_s1 = inlined_call_operand.hbm [shape: f32[128,128], index: 1, kind: input, shape index: {}]   ;;  %s443_s2 = inlined_call_operand.vmem [shape: f32[1,128], index: 2, kind: input, shape index: {}]   ;;  %s444_s3 = inlined_call_operand.hbm [shape: f32[16,128], index: 3, kind: output, shape index: {}]  }
   0x1   :  { %9 = vsyncpa [#allocation7], 0 }
   0x2   :  { %10 = vsyncpa [#allocation5], 0  ;;  %s368_s12 = smov [#allocation3]   ;;  %s296_s16 = scalar_lea.hbm %s441_s0, 256 }
   0x3   :  { %s16_s13 = sshll.u32 %s368_s12, 4  ;;  %p297_p0 = scmp.ne.s32.totalorder %s441_s0, %s296_s16  ;;  %s17_s13 = int_to_ptr.vmem [resolvable:$true] %s16_s13 }
   0x4   :  { %p300_p1 = scmp.lt.u32.totalorder %s296_s16, %s441_s0 }
   0x6   :  { %p302_p2 = pnand %p300_p1, %p297_p0 }
   0x8   :  { %305 = shalt.err (!%p302_p2)
}
   0x9   :  { %s306_s21 = scalar_lea.vmem %s17_s13, 256  ;;  %p311_p4 = scmp.lt.s32.totalorder %s17_s13, %s17_s13 }
   0xa   :  { %p307_p3 = scmp.ne.s32.totalorder %s17_s13, %s306_s21  ;;  %p312_p5 = scmp.lt.s32.totalorder %s306_s21, %s306_s21 }
   0xc   :  { %p313_p6 = por %p312_p5, %p311_p4 }
   0xe   :  { %p314_p7 = pnand %p313_p6, %p307_p3 }
  0x10   :  { %317 = shalt.err (!%p314_p7)
}
  0x11   :  { %s369_s22 = smov 128   ;;  %s370_s23 = smov 8  }
  0x12   :  { %22 = dma.hbm_to_vmem [thread:$0]  %s441_s0, 256, %s17_s13, [#allocation4], %s369_s22, %s369_s22, %s370_s23  }
  0x13   :  { %s371_s26 = smov [#allocation6]   ;;  %s318_s30 = scalar_lea.hbm %s442_s1, 2048 }
  0x14   :  { %s28_s27 = sshll.u32 %s371_s26, 4  ;;  %p319_p8 = scmp.ne.s32.totalorder %s442_s1, %s318_s30  ;;  %s29_s27 = int_to_ptr.vmem [resolvable:$true] %s28_s27 }
  0x15   :  { %p322_p9 = scmp.lt.u32.totalorder %s318_s30, %s442_s1 }
  0x17   :  { %p324_p10 = pnand %p322_p9, %p319_p8 }
  0x19   :  { %327 = shalt.err (!%p324_p10)
}
  0x1a   :  { %s328_s8 = scalar_lea.vmem %s29_s27, 2048  ;;  %p333_p12 = scmp.lt.s32.totalorder %s29_s27, %s29_s27 }
  0x1b   :  { %p329_p11 = scmp.ne.s32.totalorder %s29_s27, %s328_s8  ;;  %p334_p13 = scmp.lt.s32.totalorder %s328_s8, %s328_s8 }
  0x1d   :  { %p335_p0 = por %p334_p13, %p333_p12 }
  0x1f   :  { %p336_p1 = pnand %p335_p0, %p329_p11 }
  0x21   :  { %339 = shalt.err (!%p336_p1)
}
  0x22   :  { %34 = dma.hbm_to_vmem [thread:$0]  %s442_s1, 2048, %s29_s27, [#allocation7], %s369_s22, %s369_s22, %s370_s23  }
  0x23   :  { %362 = dma.done.wait [#allocation4], 256  }
  0x24   :  { %363 = vsyncadd [#allocation4], 4294967040 }
  0x25   :  { %364 = dma.done.wait [#allocation7], 2048  }
  0x26   :  { %365 = vsyncadd [#allocation7], 4294965248  ;;  %v47_v0 = vld [vmem:[#allocation3] sm:$0xff]  ;;  %v48_v1 = vld [vmem:[#allocation3 + $0x8] sm:$0xff]  ;;  %s372_s11 = smov [#allocation8]  }
  0x27   :  { %49 = vadd.xlane.f32.xlu0 %v47_v0  ;;  %v83_v2 = vld [vmem:[#allocation6] sm:$0xff]  ;;  %v84_v3 = vld [vmem:[#allocation6 + $0x8] sm:$0xff]  ;;  %v85_v4 = vld [vmem:[#allocation6 + $0x10] sm:$0xff]  ;;  %s188_s12 = sshll.u32 %s372_s11, 4  ;;  %s189_s12 = int_to_ptr.vmem [resolvable:$true] %s188_s12 }
  0x28   :  { %v255_v5 = vpack.c.bf16 %v84_v3, %v83_v2  ;;  %v86_v6 = vld [vmem:[#allocation6 + $0x18] sm:$0xff]  ;;  %v87_v16 = vld [vmem:[#allocation6 + $0x20] sm:$0xff]  ;;  %v88_v17 = vld [vmem:[#allocation6 + $0x28] sm:$0xff]  ;;  %s340_s13 = scalar_lea.vmem %s189_s12, 256  ;;  %p345_p3 = scmp.lt.s32.totalorder %s189_s12, %s189_s12 }
  0x29   :  { %v259_v7 = vpack.c.bf16 %v86_v6, %v85_v4  ;;  %v263_v18 = vpack.c.bf16 %v88_v17, %v87_v16  ;;  %v89_v19 = vld [vmem:[#allocation6 + $0x30] sm:$0xff]  ;;  %v90_v20 = vld [vmem:[#allocation6 + $0x38] sm:$0xff]  ;;  %v91_v22 = vld [vmem:[#allocation6 + $0x40] sm:$0xff]  ;;  %p341_p2 = scmp.ne.s32.totalorder %s189_s12, %s340_s13  ;;  %p346_p4 = scmp.lt.s32.totalorder %s340_s13, %s340_s13 }
  0x2a   :  { %256 = vmatprep.subr.bf16.mxu0 %v255_v5  ;;  %v267_v21 = vpack.c.bf16 %v90_v20, %v89_v19  ;;  %v92_v23 = vld [vmem:[#allocation6 + $0x48] sm:$0xff]  ;;  %v93_v25 = vld [vmem:[#allocation6 + $0x50] sm:$0xff]  ;;  %v94_v26 = vld [vmem:[#allocation6 + $0x58] sm:$0xff] }
  0x2b   :  { %51 = vadd.xlane.f32.xlu0 %v48_v1  ;;  %258 = vmatpush3.bf16.msra.mxu0 %v255_v5  ;;  %v271_v24 = vpack.c.bf16 %v92_v23, %v91_v22  ;;  %v275_v27 = vpack.c.bf16 %v94_v26, %v93_v25  ;;  %v95_v28 = vld [vmem:[#allocation6 + $0x60] sm:$0xff]  ;;  %v96_v29 = vld [vmem:[#allocation6 + $0x68] sm:$0xff]  ;;  %v97_v30 = vld [vmem:[#allocation6 + $0x70] sm:$0xff]  ;;  %p347_p5 = por %p346_p4, %p345_p3 }
  0x2c   :  { %260 = vmatprep.subr.bf16.mxu0 %v259_v7  ;;  %v279_v31 = vpack.c.bf16 %v96_v29, %v95_v28  ;;  %v98_v32 = vld [vmem:[#allocation6 + $0x78] sm:$0xff]  ;;  %v201_v52 = vld [vmem:[%s443_s2] ss:$0 sm:$0xff] }
  0x2d   :  { %v283_v33 = vpack.c.bf16 %v98_v32, %v97_v30  ;;  %p348_p6 = pnand %p347_p5, %p341_p2 }
  0x2f   :  { %262 = vmatpush3.bf16.msra.mxu0 %v259_v7 }
  0x30   :  { %264 = vmatprep.subr.bf16.mxu0 %v263_v18 }
  0x33   :  { %266 = vmatpush3.bf16.msra.mxu0 %v263_v18 }
  0x34   :  { %268 = vmatprep.subr.bf16.mxu0 %v267_v21 }
  0x37   :  { %270 = vmatpush3.bf16.msra.mxu0 %v267_v21 }
  0x38   :  { %272 = vmatprep.subr.bf16.mxu0 %v271_v24 }
  0x3b   :  { %274 = vmatpush3.bf16.msra.mxu0 %v271_v24 }
  0x3c   :  { %276 = vmatprep.subr.bf16.mxu0 %v275_v27 }
  0x3f   :  { %278 = vmatpush3.bf16.msra.mxu0 %v275_v27 }
  0x40   :  { %280 = vmatprep.subr.bf16.mxu0 %v279_v31 }
  0x43   :  { %282 = vmatpush3.bf16.msra.mxu0 %v279_v31 }
  0x44   :  { %284 = vmatprep.subr.bf16.mxu0 %v283_v33 }
  0x47   :  { %286 = vmatpush3.bf16.msra.mxu0 %v283_v33 }
  0xb4   :  { %v50_v8 = vpop.xlane.xlu0 %49 }
  0xb5   :  { %v53_v9 = vmul.f32 0.03125, %v50_v8 }
  0xb7   :  { %v55_v10 = vsub.f32 %v47_v0, %v53_v9  ;;  %v63_v34 = vmul.f32 %v53_v9, %v53_v9 }
  0xb8   :  { %v52_v11 = vpop.xlane.xlu0 %51 }
  0xb9   :  { %v54_v12 = vmul.f32 0.03125, %v52_v11  ;;  %v57_v13 = vmul.f32 %v55_v10, %v55_v10  ;;  %v65_v36 = vmul.f32 96.0, %v63_v34 }
  0xbb   :  { %v56_v14 = vsub.f32 %v48_v1, %v54_v12  ;;  %59 = vadd.xlane.f32.xlu1 %v57_v13  ;;  %v64_v35 = vmul.f32 %v54_v12, %v54_v12 }
  0xbd   :  { %v58_v15 = vmul.f32 %v56_v14, %v56_v14  ;;  %v66_v39 = vmul.f32 96.0, %v64_v35 }
  0xbf   :  { %61 = vadd.xlane.f32.xlu1 %v58_v15 }
 0x148   :  { %v60_v37 = vpop.xlane.xlu1 %59 }
 0x149   :  { %v67_v38 = vsub.f32 %v60_v37, %v65_v36 }
 0x14b   :  { %v69_v40 = vmul.f32 0.03125, %v67_v38 }
 0x14c   :  { %v62_v41 = vpop.xlane.xlu1 %61 }
 0x14d   :  { %v71_v42 = vmax.f32 %v69_v40, 0.0  ;;  %v68_v43 = vsub.f32 %v62_v41, %v66_v39 }
 0x14f   :  { %v73_v44 = vadd.f32 1e-05, %v71_v42  ;;  %v70_v45 = vmul.f32 0.03125, %v68_v43 }
 0x151   :  { %292 = vrsqrt.f32 %v73_v44  ;;  %v72_v46 = vmax.f32 %v70_v45, 0.0 }
 0x153   :  { %v74_v47 = vadd.f32 1e-05, %v72_v46 }
 0x155   :  { %294 = vrsqrt.f32 %v74_v47 }
 0x15b   :  { %v293_v48 = vpop.eup %292 }
 0x15c   :  { %v77_v49 = vmul.f32 %v293_v48, %v55_v10 }
 0x15e   :  { %252 = vmatprep.mubr.f32.mxu0 %v77_v49 }
 0x15f   :  { %v295_v50 = vpop.eup %294 }
 0x160   :  { %v78_v51 = vmul.f32 %v295_v50, %v56_v14 }
 0x162   :  { %253 = vmatmul.mubr.f32.vlgmr.msra.gmra.mrb[0].mxu0 %v78_v51 }
 0x235   :  { %v254_v53 = vpop.f32.mrb[0].mxu0 }
 0x236   :  { %v178_v54 = vadd.f32 %v254_v53, %v201_v52  ;;  %v172_v55 = vpop.f32.mrb[1].mxu0 }
 0x237   :  { %v173_v56 = vadd.f32 %v201_v52, %v172_v55 }
 0x238   :  { %182 = vst [vmem:[#allocation8 + $0x8] sm:$0xff] %v178_v54 }
 0x239   :  { %181 = vst [vmem:[#allocation8] sm:$0xff] %v173_v56 }
 0x23a   :  { %351 = shalt.err (!%p348_p6)
}
 0x23b   :  { %s352_s2 = scalar_lea.hbm %s444_s3, 256 }
 0x23c   :  { %p353_p7 = scmp.ne.s32.totalorder %s444_s3, %s352_s2  ;;  %p356_p8 = scmp.lt.u32.totalorder %s352_s2, %s444_s3 }
 0x23e   :  { %p358_p9 = pnand %p356_p8, %p353_p7 }
 0x240   :  { %361 = shalt.err (!%p358_p9)
}
 0x241   :  { %194 = dma.vmem_to_hbm [thread:$0]  %s189_s12, 256, %s444_s3, [#allocation5], %s369_s22, %s369_s22, %s370_s23  }
 0x242   :  { %366 = dma.done.wait [#allocation5], 256  }
 0x243   :  { %367 = vsyncadd [#allocation5], 4294967040 }
 0x244   :  { %198 = vsyncpa [#allocation4], 1 }
 0x245   :  { %199 = vsyncpa [#allocation7], 1 }
 0x246   :  { %200 = vsyncpa [#allocation5], 1 }

</bundles_post_ra>
